<compile_context>
chip_gen: v7x
topology: tpu7x:2x2x1
jax: 0.10.0
libtpu: 0.0.40
codegen_flags: <defaults>
</compile_context>

<pallas_src>
import jax
import jax.numpy as jnp
from jax.experimental import pallas as pl
from jax.experimental.pallas import tpu as pltpu

_LANE = 128
_SUBLANE = 8
_VMEM_BUDGET = 44 * 1024 * 1024          # keep well under v7x's 64 MiB physical
_VMEM_LIMIT_CAP = 48 * 1024 * 1024


def _round_up(a, b):
    return (a + b - 1) // b * b


def _largest_divisor_tile(total, max_tile, granule):
    """Largest multiple of `granule` that divides `total` and is <= max_tile."""
    t = min(max_tile, total)
    t -= t % granule
    t = max(t, granule)
    while t > granule and total % t != 0:
        t -= granule
    return t


def _choose_token_tile(n_pad, tm_max):
    """Token tile in [tm_max/2, tm_max] (multiple of 8) minimizing padded rows."""
    start = tm_max - tm_max % _SUBLANE
    lo = max(_SUBLANE, (tm_max // 2) - (tm_max // 2) % _SUBLANE)
    best_tm, best_total = start, _round_up(n_pad, start)
    for tm in range(start, lo - 1, -_SUBLANE):
        total = _round_up(n_pad, tm)
        if total < best_total:
            best_tm, best_total = tm, total
        if total == n_pad:
            break
    return best_tm


def _make_mlp_kernel(resident, TK, approximate_gelu):
    def kernel(x_ref, w1_ref, b1_ref, w2_ref, b2_ref, o_ref, acc_ref):
        k = pl.program_id(1)

        @pl.when(k == 0)
        def _():
            acc_ref[...] = jnp.zeros_like(acc_ref)

        if resident:
            # Weights are fully VMEM-resident; slice the k-chunk in place.
            kk = pl.multiple_of(k * TK, TK)
            w1 = w1_ref[:, pl.ds(kk, TK)]
            b1 = b1_ref[:, pl.ds(kk, TK)]
            w2 = w2_ref[pl.ds(kk, TK), :]
        else:
            # Streaming path: BlockSpecs already deliver the k-th weight tile.
            w1 = w1_ref[...]
            b1 = b1_ref[...]
            w2 = w2_ref[...]

        # fc1 tile: [TM, H] @ [H, TK] -> f32 accumulate on the MXU (bf16 operands)
        h = jnp.dot(x_ref[...], w1, preferred_element_type=jnp.float32)
        h = h + b1
        # tanh-GELU runs on the (otherwise idle) EUP slot; exact erf optional.
        h = jax.nn.gelu(h, approximate=approximate_gelu)
        # dropout1: identity (eval mode)

        # fc2 partial: [TM, TK] @ [TK, H] accumulated over the mlp_dim (k) axis.
        acc_ref[...] += jnp.dot(h.astype(w2.dtype), w2,
                                preferred_element_type=jnp.float32)

        @pl.when(k == pl.num_programs(1) - 1)
        def _():
            # fc2 bias + cast; dropout2: identity (eval mode)
            o_ref[...] = (acc_ref[...] + b2_ref[...]).astype(o_ref.dtype)

    return kernel


def prepare_mlp_params(w1, b1, w2, b2):
    """Pad + cast parameters once (static across forward passes).

    w1: [H, M], b1: [M], w2: [M, H], b2: [H].
    Feature dims are zero-padded to lane-dense sizes (128-multiples; mlp_dim to
    256-multiples when > 128 so the k tile can fill the 256-wide v6e/v7x MXU).
    Zero padding is mathematically inert: gelu(0) == 0 and padded weight
    rows/cols are zero.
    """
    H, M = w1.shape
    H_pad = _round_up(H, _LANE)
    M_pad = _round_up(M, 256) if M > _LANE else _LANE
    w1p = jnp.zeros((H_pad, M_pad), jnp.bfloat16).at[:H, :M].set(
        w1.astype(jnp.bfloat16))
    w2p = jnp.zeros((M_pad, H_pad), jnp.bfloat16).at[:M, :H].set(
        w2.astype(jnp.bfloat16))
    b1p = jnp.zeros((1, M_pad), jnp.float32).at[0, :M].set(b1.astype(jnp.float32))
    b2p = jnp.zeros((1, H_pad), jnp.float32).at[0, :H].set(b2.astype(jnp.float32))
    return {"w1": w1p, "b1": b1p, "w2": w2p, "b2": b2p,
            "hidden_dim": H, "mlp_dim": M}


def mlp_pallas_prepared(x, params, *, tm_max_resident=512, tm_max_streaming=1024,
                        tk_max=512, approximate_gelu=True):
    """x: [B, S, H]; params from prepare_mlp_params."""
    B, S, H = x.shape
    assert H == params["hidden_dim"], "hidden_dim mismatch"
    w1p, b1p, w2p, b2p = params["w1"], params["b1"], params["w2"], params["b2"]
    H_pad, M_pad = w1p.shape
    M = params["mlp_dim"]
    out_dtype = x.dtype
    out_itemsize = jnp.dtype(out_dtype).itemsize
    n_tok = B * S

    def _est(resident, tm, tk):
        e = 2 * tm * H_pad * 2               # x tiles (double-buffered, bf16)
        e += 2 * tm * H_pad * out_itemsize   # out tiles (double-buffered)
        e += tm * H_pad * 4                  # f32 accumulator scratch
        e += tm * tk * 4                     # gelu intermediate
        if resident:
            e += 2 * (w1p.size + w2p.size) * 2       # full weights (x2 buffers)
            e += 2 * (b1p.size + b2p.size) * 4
        else:
            e += 2 * 2 * (H_pad * tk) * 2 * 2        # w1/w2 k-tiles (x2 buffers)
            e += 2 * (tk + H_pad) * 4
        return e

    # Weight residency: cuts weight HBM traffic by a factor of n_tiles.
    resident = _est(True, 64, _LANE) <= _VMEM_BUDGET
    tm_max = tm_max_resident if resident else tm_max_streaming

    # Token tile: minimize padding waste; keep >= 2 tiles when possible so the
    # "parallel" grid axis actually splits across both v7x TensorCores.
    n_pad = _round_up(n_tok, _SUBLANE)
    if n_pad <= tm_max:
        if n_pad >= 2 * _SUBLANE and (n_pad // 2) % _SUBLANE == 0:
            TM = n_pad // 2
        else:
            TM = n_pad
    else:
        TM = _choose_token_tile(n_pad, tm_max)

    # mlp_dim tile: must divide M_pad exactly (no per-call weight re-padding).
    tk_granule = 256 if (M_pad % 256 == 0) else _LANE
    TK = _largest_divisor_tile(M_pad, tk_max, tk_granule)

    # Shrink tiles if the VMEM estimate exceeds the budget.
    while _est(resident, TM, TK) > _VMEM_BUDGET and TM > 64:
        TM = max(64, ((TM // 2) // _SUBLANE) * _SUBLANE)
    while _est(resident, TM, TK) > _VMEM_BUDGET and TK > _LANE:
        TK = _largest_divisor_tile(M_pad, TK // 2, _LANE)

    n_final = _round_up(n_pad, TM)
    vmem_limit = int(min(_VMEM_LIMIT_CAP,
                         max(32 * 1024 * 1024, _est(resident, TM, TK) * 1.3)))

    # Per-call x prep: cast to bf16 MXU operand; pad only if needed.
    x2d = x.reshape(n_tok, H).astype(jnp.bfloat16)
    if n_final != n_tok or H_pad != H:
        x2d = jnp.zeros((n_final, H_pad), jnp.bfloat16).at[:n_tok, :H].set(x2d)

    grid = (n_final // TM, M_pad // TK)

    if resident:
        w1_spec = pl.BlockSpec((H_pad, M_pad), lambda i, k: (0, 0))
        b1_spec = pl.BlockSpec((1, M_pad), lambda i, k: (0, 0))
        w2_spec = pl.BlockSpec((M_pad, H_pad), lambda i, k: (0, 0))
    else:
        w1_spec = pl.BlockSpec((H_pad, TK), lambda i, k: (0, k))
        b1_spec = pl.BlockSpec((1, TK), lambda i, k: (0, k))
        w2_spec = pl.BlockSpec((TK, H_pad), lambda i, k: (k, 0))

    weight_passes = 1 if resident else grid[0]
    cost = pl.CostEstimate(
        flops=4 * n_tok * H_pad * M_pad,          # two matmuls
        transcendentals=n_tok * M,                # tanh/erf in GELU
        bytes_accessed=(x2d.size * 2
                        + weight_passes * (w1p.size + w2p.size) * 2
                        + b1p.size * 4 + b2p.size * 4
                        + n_final * H_pad * out_itemsize),
    )

    out2d = pl.pallas_call(
        _make_mlp_kernel(resident, TK, approximate_gelu),
        out_shape=jax.ShapeDtypeStruct((n_final, H_pad), out_dtype),
        grid_spec=pltpu.PrefetchScalarGridSpec(
            num_scalar_prefetch=0,
            grid=grid,
            in_specs=[
                pl.BlockSpec((TM, H_pad), lambda i, k: (i, 0)),   # x tile
                w1_spec,                                          # fc1 weight
                b1_spec,                                          # fc1 bias
                w2_spec,                                          # fc2 weight
                pl.BlockSpec((1, H_pad), lambda i, k: (0, 0)),    # fc2 bias
            ],
            out_specs=pl.BlockSpec((TM, H_pad), lambda i, k: (i, 0)),
            scratch_shapes=[pltpu.VMEM((TM, H_pad), jnp.float32)],
        ),
        compiler_params=pltpu.CompilerParams(
            dimension_semantics=("parallel", "arbitrary"),
            vmem_limit_bytes=vmem_limit,
        ),
        cost_estimate=cost,
    )(x2d, w1p, b1p, w2p, b2p)

    if n_final != n_tok or H_pad != H:
        out2d = out2d[:n_tok, :H]
    return out2d.reshape(B, S, H)


def mlp_pallas(x, w1, b1, w2, b2, **kwargs):
    """Convenience one-shot wrapper (prepares params on every call)."""
    return mlp_pallas_prepared(x, prepare_mlp_params(w1, b1, w2, b2), **kwargs)


def _reference_mlp(x, w1, b1, w2, b2, approximate_gelu=True):
    """Reference mirroring the kernel's dtype path (bf16 MXU, f32 accum)."""
    xb = x.astype(jnp.bfloat16)
    w1b = w1.astype(jnp.bfloat16)
    w2b = w2.astype(jnp.bfloat16)
    h = jnp.einsum("bsh,hm->bsm", xb, w1b,
                   preferred_element_type=jnp.float32) + b1
    h = jax.nn.gelu(h, approximate=approximate_gelu)
    o = jnp.einsum("bsm,mh->bsh", h.astype(jnp.bfloat16), w2b,
                   preferred_element_type=jnp.float32) + b2
    return o.astype(x.dtype)


if __name__ == "__main__":
    # config: hidden_dim=32, mlp_dim=64 (dropout_rate unused in eval)
    B, S, H, M = 2, 8, 32, 64
    key = jax.random.PRNGKey(0)
    kx, kw1, kb1, kw2, kb2 = jax.random.split(key, 5)

    x = jax.random.normal(kx, (B, S, H), dtype=jnp.float32)

    # Deterministic parameter init (PyTorch Linear-style uniform bounds).
    bound1 = 1.0 / (H ** 0.5)
    w1 = jax.random.uniform(kw1, (H, M), jnp.float32, -bound1, bound1)
    b1 = jax.random.uniform(kb1, (M,), jnp.float32, -bound1, bound1)
    bound2 = 1.0 / (M ** 0.5)
    w2 = jax.random.uniform(kw2, (M, H), jnp.float32, -bound2, bound2)
    b2 = jax.random.uniform(kb2, (H,), jnp.float32, -bound2, bound2)

    # Prepare (pad + cast) parameters once, then run the kernel.
    params = prepare_mlp_params(w1, b1, w2, b2)
    out = mlp_pallas_prepared(x, params, approximate_gelu=True)
    out = jax.block_until_ready(out)

    ref = _reference_mlp(x, w1, b1, w2, b2, approximate_gelu=True)
    assert out.shape == (B, S, H)
    assert jnp.allclose(out, ref, atol=1e-2, rtol=1e-2), \
        float(jnp.max(jnp.abs(out - ref)))

    print("KERNEL_OK")
</pallas_src>

<mosaic_0001>
module attributes {stable_mosaic.version = 11 : i64} {
  func.func @kernel(%arg0: i32, %arg1: i32, %arg2: memref<8x128xbf16, #tpu.memory_space<vmem>>, %arg3: memref<128x128xbf16, #tpu.memory_space<vmem>>, %arg4: memref<1x128xf32, #tpu.memory_space<vmem>>, %arg5: memref<128x128xbf16, #tpu.memory_space<vmem>>, %arg6: memref<1x128xf32, #tpu.memory_space<vmem>>, %arg7: memref<8x128xf32, #tpu.memory_space<vmem>>, %arg8: memref<8x128xf32, #tpu.memory_space<vmem>>) attributes {dimension_semantics = [#tpu.dimension_semantics<parallel>, #tpu.dimension_semantics<arbitrary>], iteration_bounds = array<i64: 2, 1>, scalar_prefetch = 0 : i64, scratch_operands = 1 : i64, tpu.core_type = #tpu.core_type<tc>, window_params = [{transform_indices = @transform_0, window_bounds = array<i64: 8, 128>}, {pipeline_mode = #tpu.pipeline_mode<synchronous>, transform_indices = @transform_1, window_bounds = array<i64: 128, 128>}, {pipeline_mode = #tpu.pipeline_mode<synchronous>, transform_indices = @transform_2, window_bounds = array<i64: 1, 128>}, {pipeline_mode = #tpu.pipeline_mode<synchronous>, transform_indices = @transform_3, window_bounds = array<i64: 128, 128>}, {pipeline_mode = #tpu.pipeline_mode<synchronous>, transform_indices = @transform_4, window_bounds = array<i64: 1, 128>}, {transform_indices = @transform_5, window_bounds = array<i64: 8, 128>}]} {
    %c0_i32 = arith.constant 0 : i32
    %0 = arith.cmpi eq, %arg1, %c0_i32 : i32
    %1 = arith.extui %0 : i1 to i32
    %c0_i32_0 = arith.constant 0 : i32
    %2 = arith.cmpi ne, %1, %c0_i32_0 : i32
    scf.if %2 {
      %cst_16 = arith.constant 0.000000e+00 : f32
      %36 = vector.broadcast %cst_16 : f32 to vector<8x128xf32>
      %c0_17 = arith.constant 0 : index
      %c0_18 = arith.constant 0 : index
      %37 = vector.load %arg8[%c0_17, %c0_18] : memref<8x128xf32, #tpu.memory_space<vmem>>, vector<8x128xf32>
      tpu.vector_store %arg8[%c0_17, %c0_18], %36 {strides = array<i32>} : memref<8x128xf32, #tpu.memory_space<vmem>>, vector<8x128xf32>,
    } else {
    }
    %c128_i32 = arith.constant 128 : i32
    %3 = arith.muli %arg1, %c128_i32 : i32
    %4 = tpu.assume_multiple %3, 128 : i32
    %c0 = arith.constant 0 : index
    %5 = arith.index_cast %4 : i32 to index
    %6 = vector.load %arg3[%c0, %5] : memref<128x128xbf16, #tpu.memory_space<vmem>>, vector<128x128xbf16>
    %c0_1 = arith.constant 0 : index
    %7 = arith.index_cast %4 : i32 to index
    %8 = vector.load %arg4[%c0_1, %7] : memref<1x128xf32, #tpu.memory_space<vmem>>, vector<1x128xf32>
    %9 = arith.index_cast %4 : i32 to index
    %c0_2 = arith.constant 0 : index
    %10 = vector.load %arg5[%9, %c0_2] : memref<128x128xbf16, #tpu.memory_space<vmem>>, vector<128x128xbf16>
    %c0_3 = arith.constant 0 : index
    %c0_4 = arith.constant 0 : index
    %11 = vector.load %arg2[%c0_3, %c0_4] : memref<8x128xbf16, #tpu.memory_space<vmem>>, vector<8x128xbf16>
    %cst = arith.constant dense<0.000000e+00> : vector<8x128xf32>
    %12 = tpu.matmul %11, %6, %cst {dimension_numbers = #tpu.dot_dimension_numbers<[1], [0], [0], [1], [0, 0, 1, 1], [], []>} : vector<8x128xbf16>, vector<128x128xbf16>, vector<8x128xf32> -> vector<8x128xf32>
    %13 = vector.broadcast %8 : vector<1x128xf32> to vector<8x128xf32>
    %14 = arith.addf %12, %13 : vector<8x128xf32>
    %15 = arith.mulf %14, %14 : vector<8x128xf32>
    %16 = arith.mulf %14, %15 : vector<8x128xf32>
    %cst_5 = arith.constant 4.471500e-02 : f32
    %17 = vector.broadcast %cst_5 : f32 to vector<8x128xf32>
    %18 = arith.mulf %17, %16 : vector<8x128xf32>
    %19 = arith.addf %14, %18 : vector<8x128xf32>
    %cst_6 = arith.constant 0.797884583 : f32
    %20 = vector.broadcast %cst_6 : f32 to vector<8x128xf32>
    %21 = arith.mulf %20, %19 : vector<8x128xf32>
    %22 = math.tanh %21 : vector<8x128xf32>
    %cst_7 = arith.constant 1.000000e+00 : f32
    %23 = vector.broadcast %cst_7 : f32 to vector<8x128xf32>
    %24 = arith.addf %23, %22 : vector<8x128xf32>
    %cst_8 = arith.constant 5.000000e-01 : f32
    %25 = vector.broadcast %cst_8 : f32 to vector<8x128xf32>
    %26 = arith.mulf %25, %24 : vector<8x128xf32>
    %27 = arith.mulf %14, %26 : vector<8x128xf32>
    %c0_9 = arith.constant 0 : index
    %c0_10 = arith.constant 0 : index
    %28 = vector.load %arg8[%c0_9, %c0_10] : memref<8x128xf32, #tpu.memory_space<vmem>>, vector<8x128xf32>
    %29 = arith.truncf %27 : vector<8x128xf32> to vector<8x128xbf16>
    %cst_11 = arith.constant dense<0.000000e+00> : vector<8x128xf32>
    %30 = tpu.matmul %29, %10, %cst_11 {dimension_numbers = #tpu.dot_dimension_numbers<[1], [0], [0], [1], [0, 0, 1, 1], [], []>} : vector<8x128xbf16>, vector<128x128xbf16>, vector<8x128xf32> -> vector<8x128xf32>
    %31 = arith.addf %28, %30 : vector<8x128xf32>
    %c0_12 = arith.constant 0 : index
    %c0_13 = arith.constant 0 : index
    %32 = vector.load %arg8[%c0_12, %c0_13] : memref<8x128xf32, #tpu.memory_space<vmem>>, vector<8x128xf32>
    tpu.vector_store %arg8[%c0_12, %c0_13], %31 {strides = array<i32>} : memref<8x128xf32, #tpu.memory_space<vmem>>, vector<8x128xf32>,
    %c0_i32_14 = arith.constant 0 : i32
    %33 = arith.cmpi eq, %arg1, %c0_i32_14 : i32
    %34 = arith.extui %33 : i1 to i32
    %c0_i32_15 = arith.constant 0 : i32
    %35 = arith.cmpi ne, %34, %c0_i32_15 : i32
    scf.if %35 {
      %c0_16 = arith.constant 0 : index
      %c0_17 = arith.constant 0 : index
      %36 = vector.load %arg8[%c0_16, %c0_17] : memref<8x128xf32, #tpu.memory_space<vmem>>, vector<8x128xf32>
      %c0_18 = arith.constant 0 : index
      %c0_19 = arith.constant 0 : index
      %37 = vector.load %arg6[%c0_18, %c0_19] : memref<1x128xf32, #tpu.memory_space<vmem>>, vector<1x128xf32>
      %38 = vector.broadcast %37 : vector<1x128xf32> to vector<8x128xf32>
      %39 = arith.addf %36, %38 : vector<8x128xf32>
      %c0_20 = arith.constant 0 : index
      %c0_21 = arith.constant 0 : index
      %40 = vector.load %arg7[%c0_20, %c0_21] : memref<8x128xf32, #tpu.memory_space<vmem>>, vector<8x128xf32>
      tpu.vector_store %arg7[%c0_20, %c0_21], %39 {strides = array<i32>} : memref<8x128xf32, #tpu.memory_space<vmem>>, vector<8x128xf32>,
    } else {
    }
    return
  }
  func.func @transform_0(%arg0: i32, %arg1: i32) -> (i32, i32) {
    %c0_i32 = arith.constant 0 : i32
    %c0_i32_0 = arith.constant 0 : i32
    return %arg0, %c0_i32 : i32, i32
  }
  func.func @transform_1(%arg0: i32, %arg1: i32) -> (i32, i32) {
    %c0_i32 = arith.constant 0 : i32
    %c0_i32_0 = arith.constant 0 : i32
    %c0_i32_1 = arith.constant 0 : i32
    return %c0_i32, %c0_i32_0 : i32, i32
  }
  func.func @transform_2(%arg0: i32, %arg1: i32) -> (i32, i32) {
    %c0_i32 = arith.constant 0 : i32
    %c0_i32_0 = arith.constant 0 : i32
    %c0_i32_1 = arith.constant 0 : i32
    return %c0_i32, %c0_i32_0 : i32, i32
  }
  func.func @transform_3(%arg0: i32, %arg1: i32) -> (i32, i32) {
    %c0_i32 = arith.constant 0 : i32
    %c0_i32_0 = arith.constant 0 : i32
    %c0_i32_1 = arith.constant 0 : i32
    return %c0_i32, %c0_i32_0 : i32, i32
  }
  func.func @transform_4(%arg0: i32, %arg1: i32) -> (i32, i32) {
    %c0_i32 = arith.constant 0 : i32
    %c0_i32_0 = arith.constant 0 : i32
    %c0_i32_1 = arith.constant 0 : i32
    return %c0_i32, %c0_i32_0 : i32, i32
  }
  func.func @transform_5(%arg0: i32, %arg1: i32) -> (i32, i32) {
    %c0_i32 = arith.constant 0 : i32
    %c0_i32_0 = arith.constant 0 : i32
    return %arg0, %c0_i32 : i32, i32
  }
}

</mosaic_0001>

<bundles_post_ra>
// kernel: tpu_custom_call.1
= control target key start
LH: loop header
LB: loop body
LE: loop exit
PB: predicated region body
PF: predicated region fallthrough
CT: control target
= control target key end

     0   :  { %10 = vsyncpa [#allocation4], 0  ;;  %s1325_s0 = inlined_call_operand.hbm [shape: bf16[16,128], index: 0, kind: input, shape index: {}]   ;;  %s1326_s1 = inlined_call_operand.hbm [shape: bf16[128,128], index: 1, kind: input, shape index: {}]   ;;  %s1327_s2 = inlined_call_operand.vmem [shape: f32[1,128], index: 2, kind: input, shape index: {}]   ;;  %s1328_s3 = inlined_call_operand.hbm [shape: bf16[128,128], index: 3, kind: input, shape index: {}]   ;;  %s1329_s4 = inlined_call_operand.vmem [shape: f32[1,128], index: 4, kind: input, shape index: {}]   ;;  %s1330_s5 = inlined_call_operand.hbm [shape: f32[16,128], index: 5, kind: output, shape index: {}]  }
   0x1   :  { %12 = vsyncpa [#allocation4 + $0x1], 0 }
   0x2   :  { %13 = vsyncpa [#allocation7], 0 }
   0x3   :  { %14 = vsyncpa [#allocation5], 0 }
   0x4   :  { %16 = vsyncpa [#allocation5 + $0x1], 0  ;;  %s1065_s18 = smov 0   ;;  %s1067_s19 = smov 0  }
   0x5   :  { %s1069_s20 = smov 0   ;;  %s1071_s21 = smov 0  }
   0x6   :  { %s1073_s22 = smov 0   ;;  %s1075_s23 = smov 0  }
   0x7 LB: > { %s655_s24 = sadd.s32 4294967295, %s1025_s23   ;;  %s656_s25 = sadd.s32 4294967294, %s1025_s23   ;;  %s1025_s23 = sphi %s1075_s23, %s22_s23   ;;  %s1021_s22 = sphi %s1073_s22, %s1352_s22   ;;  %s1017_s21 = sphi %s1071_s21, %s1351_s21   ;;  %s1013_s20 = sphi %s1069_s20, %s1350_s20   ;;  %s1009_s19 = sphi %s1067_s19, %s1349_s19   ;;  %s1005_s18 = sphi %s1065_s18, %s1348_s18  }
   0x8   : > { %p54_p0 = scmp.ne.s32.totalorder %s1009_s19, %s1005_s18  ;;  %p1099_p1 = scmp.eq.s32.totalorder %s655_s24, 0 }
   0x9   : > { %p1103_p2 = scmp.eq.s32.totalorder %s655_s24, 1  ;;  %p168_p3 = scmp.eq.s32.totalorder %s656_s25, 1 }
   0xa   : > { %s1335_s26 = scalar_select %p1099_p1, 1, 0 }
   0xb   : > { %p1109_p4 = por %p1099_p1, %p54_p0  ;;  %p657_p5 = scmp.ge.s32.totalorder %s1025_s23, 1 }
   0xc   : > { %p1114_p6 = por %p168_p3, %p54_p0  ;;  %p175_p7 = scmp.lt.s32.totalorder %s1025_s23, 3 }
   0xd   : > { %s1337_s28 = scalar_select %p1109_p4, 1, 0 }
   0xe   : > { %s1338_s29 = scalar_select %p1114_p6, 1, 0 }
   0xf   : > { %p1119_p8 = pnand %p657_p5, %p175_p7  ;;  %s1027_s6 = smov [#allocation6]  }
  0x10   : > { %s187_s7 = sshll.u32 %s1027_s6, 4  ;;  %s1028_s9 = smov [#allocation8]   ;;  %s1123_s7 = int_to_ptr.vmem [resolvable:$true] %s187_s7 }
  0x11   : > { %p760_p9 = pneg %p1119_p8  ;;  %s203_s10 = sshll.u32 %s1028_s9, 4  ;;  %s1134_s10 = int_to_ptr.vmem [resolvable:$true] %s203_s10 }
  0x12   : > { %s853_s13 = scalar_lea.hbm %s1326_s1, 1024 }
  0x13   : > { %p1130_p11 = pnand %p760_p9, %p1099_p1  ;;  %p854_p12 = scmp.ne.s32.totalorder %s1326_s1, %s853_s13 }
  0x14   : > { %p860_p5 = scmp.lt.u32.totalorder %s853_s13, %s1326_s1 }
  0x15   : > { %p855_p13 = pneg %p1130_p11 }
  0x17   : > { %p856_p0 = pnand %p855_p13, %p854_p12 }
  0x19   : > { %p857_p3 = pneg %p856_p0 }
  0x1b   : > { %p862_p7 = pnand %p860_p5, %p857_p3 }
  0x1d   : > { %865 = shalt.err (!%p862_p7)
}
  0x1e   : > { %s866_s24 = scalar_lea.vmem %s1123_s7, 1024  ;;  %p874_p1 = scmp.lt.s32.totalorder %s1123_s7, %s1123_s7 }
  0x1f   : > { %p867_p9 = scmp.ne.s32.totalorder %s1123_s7, %s866_s24  ;;  %p875_p12 = scmp.lt.s32.totalorder %s866_s24, %s866_s24 }
  0x21   : > { %p869_p10 = pnand %p867_p9, %p855_p13  ;;  %p876_p0 = por %p875_p12, %p874_p1 }
  0x23   : > { %p870_p6 = pneg %p869_p10 }
  0x25   : > { %p877_p4 = pnand %p876_p0, %p870_p6 }
  0x27   : > { %880 = shalt.err (!%p877_p4)
}
  0x28   : > { %s1029_s25 = smov 64   ;;  %s1030_s6 = smov 4  }
  0x29   : > { %763 = dma.hbm_to_vmem [thread:$0]  (!%p1130_p11), %s1326_s1, 1024, %s1123_s7, [#allocation7], %s1029_s25, %s1029_s25, %s1030_s6  }
  0x2a   : > { %s881_s14 = scalar_lea.hbm %s1328_s3, 1024 }
  0x2b   : > { %p882_p1 = scmp.ne.s32.totalorder %s1328_s3, %s881_s14  ;;  %p888_p10 = scmp.lt.u32.totalorder %s881_s14, %s1328_s3 }
  0x2d   : > { %p884_p4 = pnand %p882_p1, %p855_p13 }
  0x2f   : > { %p885_p6 = pneg %p884_p4 }
  0x31   : > { %p890_p3 = pnand %p888_p10, %p885_p6 }
  0x33   : > { %893 = shalt.err (!%p890_p3)
}
  0x34   : > { %s894_s7 = scalar_lea.vmem %s1134_s10, 1024  ;;  %p902_p12 = scmp.lt.s32.totalorder %s1134_s10, %s1134_s10 }
  0x35   : > { %p895_p5 = scmp.ne.s32.totalorder %s1134_s10, %s894_s7  ;;  %p903_p0 = scmp.lt.s32.totalorder %s894_s7, %s894_s7 }
  0x37   : > { %p897_p7 = pnand %p895_p5, %p855_p13  ;;  %p904_p1 = por %p903_p0, %p902_p12 }
  0x39   : > { %p898_p9 = pneg %p897_p7 }
  0x3b   : > { %p905_p4 = pnand %p904_p1, %p898_p9 }
  0x3d   : > { %908 = shalt.err (!%p905_p4)
}
  0x3e   : > { %766 = dma.hbm_to_vmem [thread:$0]  (!%p1130_p11), %s1328_s3, 1024, %s1134_s10, [#allocation7], %s1029_s25, %s1029_s25, %s1030_s6  }
  0x3f   : > { %s34_s12 = sadd.s32 1, %s1021_s22  ;;  %s41_s13 = sadd.s32 1, %s1013_s20 }
  0x40   : > { %p36_p13 = scmp.ge.s32.totalorder %s34_s12, 2  ;;  %p48_p6 = scmp.ne.s32.totalorder %s1013_s20, %s1009_s19 }
  0x41   : > { %p49_p10 = scmp.eq.s32.totalorder %s1025_s23, 0  ;;  %p777_p3 = scmp.lt.s32.totalorder %s1025_s23, 2 }
  0x42   : > { %s1354_s12 = smov (%p36_p13, %s34_s12), 0  ;;  %p1198_p7 = por %p1103_p2, %p48_p6 }
  0x43   : > { %p50_p5 = por %p49_p10, %p48_p6  ;;  %s38_s14 = ssub.s32 %s1021_s22, %s1354_s12 }
  0x44   : > { %s1341_s8 = scalar_select %p1198_p7, 1, 0 }
  0x45   : > { %s220_s15 = sand.u32 1, %s1013_s20   ;;  %p39_p9 = scmp.eq.s32.totalorder %s38_s14, 0 }
  0x46   : > { %s661_s10 = sshll.u32 %s220_s15, 2  ;;  %s662_s25 = sshll.u32 %s1021_s22, 6 }
  0x47   : > { %s1207_s6 = scalar_select %p39_p9, %s1013_s20, %s41_s13  }
  0x48   : > { %s1212_s24 = scalar_lea.hbm %s1325_s0, %s662_s25  ;;  %s224_s27 = scalar_lea.vmem [#allocation3], %s661_s10 }
  0x49   : > { %s231_s7 = sshll.u32 %s224_s27, 4  ;;  %p1216_p2 = pnand %p777_p3, %p50_p5  ;;  %s1220_s7 = int_to_ptr.vmem [resolvable:$true] %s231_s7 }
  0x4a   : > { %s221_s11 = scalar_lea.sflag [#allocation4], %s220_s15  ;;  %s909_s13 = scalar_lea.hbm %s1212_s24, 64 }
  0x4b   : > { %p910_p11 = scmp.ne.s32.totalorder %s1212_s24, %s909_s13  ;;  %p911_p12 = pneg %p1216_p2 }
  0x4c   : > { %s914_s25 = scalar_lea.hbm %s1325_s0, 128  ;;  %p915_p4 = scmp.lt.u32.totalorder %s1212_s24, %s1325_s0 }
  0x4d   : > { %p912_p0 = pnand %p911_p12, %p910_p11  ;;  %p916_p13 = scmp.lt.u32.totalorder %s914_s25, %s909_s13 }
  0x4e   : > { %p918_p10 = scmp.lt.u32.totalorder %s909_s13, %s1212_s24 }
  0x4f   : > { %p913_p1 = pneg %p912_p0  ;;  %p917_p6 = por %p916_p13, %p915_p4 }
  0x51   : > { %p919_p3 = por %p918_p10, %p917_p6 }
  0x53   : > { %p920_p5 = pnand %p919_p3, %p913_p1 }
  0x55   : > { %923 = shalt.err (!%p920_p5)
}
  0x56   : > { %s924_s15 = scalar_lea.vmem %s1220_s7, 64  ;;  %s1031_s27 = smov [#allocation3]  }
  0x57   : > { %p925_p9 = scmp.ne.s32.totalorder %s1220_s7, %s924_s15  ;;  %s929_s14 = sshll.u32 %s1031_s27, 4  ;;  %s930_s14 = int_to_ptr.vmem [resolvable:$false] %s929_s14 }
  0x58   : > { %s931_s10 = scalar_lea.vmem %s930_s14, 128  ;;  %p932_p7 = scmp.lt.s32.totalorder %s1220_s7, %s930_s14 }
  0x59   : > { %p927_p11 = pnand %p925_p9, %p911_p12  ;;  %p933_p4 = scmp.lt.s32.totalorder %s931_s10, %s924_s15 }
  0x5b   : > { %p928_p0 = pneg %p927_p11  ;;  %p934_p13 = por %p933_p4, %p932_p7 }
  0x5d   : > { %p935_p6 = pnand %p934_p13, %p928_p0 }
  0x5f   : > { %938 = shalt.err (!%p935_p6)
}
  0x60   : > { %770 = dma.hbm_to_vmem [thread:$0]  (!%p1216_p2), %s1212_s24, 64, %s1220_s7, %s221_s11  }
  0x61   : > { %240 = sbr.rel (%p1119_p8) target bundleno = 613 (0x265), region = 40  ;;  %s1250_s13 = sand.u32 (!%p1119_p8), 1, %s1009_s19  }
  0x62   : > { %s664_s25 = sshll.u32 (!%p1119_p8), %s1250_s13, 2  ;;  %s243_s16 = scalar_lea.sflag (!%p1119_p8), [#allocation4], %s1250_s13 }
  0x63   : > { %s1254_s17 = scalar_lea.vmem (!%p1119_p8), [#allocation3], %s664_s25  ;;  %p1343_p7 = scmp.ne.s32.totalorder (!%p1119_p8), %s1337_s28, 0 }
  0x68   : > { %992 = dma.done.wait (%p1343_p7), %s243_s16, 64  }
  0x69   : > { %994 = vsyncadd (%p1343_p7), %s243_s16, 4294967232  ;;  %p1344_p2 = scmp.ne.s32.totalorder %s1335_s26, 0 }
  0x6b   : > { %996 = dma.done.wait (%p1344_p2), [#allocation7], 2048  }
  0x6c   : > { %998 = vsyncadd (%p1344_p2), [#allocation7], 4294965248  ;;  %v1032_v0 = vmov 0.0   ;;  %vm1033_vm0 = vmmov 0   ;;  %v835_v1 = vld [vmem:[#allocation6] sm:$0xff]   ;;  %v836_v2 = vld [vmem:[#allocation6 + $0x8] sm:$0xff]  }
  0x6d   : > { %708 = vmatprep.subr.bf16.mxu0 %v1032_v0  ;;  %724 = vmatprep.mubr.msk.bf16.mxu0 %vm1033_vm0, %v1032_v0  ;;  %v837_v3 = vld [vmem:[#allocation6 + $0x10] sm:$0xff]   ;;  %v838_v4 = vld [vmem:[#allocation6 + $0x18] sm:$0xff]   ;;  %v839_v5 = vld [vmem:[#allocation6 + $0x20] sm:$0xff]   ;;  %s667_s30 = sshll.u32 %s1250_s13, 3  ;;  %s687_s9 = sshll.u32 %s1017_s21, 7 }
  0x6e   : > { %728 = vmatprep.subr.bf16.mxu1 %v1032_v0  ;;  %744 = vmatprep.mubr.msk.bf16.mxu1 %vm1033_vm0, %v1032_v0  ;;  %v840_v6 = vld [vmem:[#allocation6 + $0x28] sm:$0xff]   ;;  %v841_v7 = vld [vmem:[#allocation6 + $0x30] sm:$0xff]   ;;  %v842_v8 = vld [vmem:[#allocation6 + $0x38] sm:$0xff]   ;;  %s280_s11 = scalar_lea.vmem [#allocation9], %s667_s30  ;;  %s1276_s10 = scalar_lea.hbm %s1330_s5, %s687_s9 }
  0x6f   : > { %709 = vmatpush3.bf16.msra.mxu0 %v835_v1  ;;  %v330_v9 = vld [vmem:[%s1254_s17] sm:$0xf]  ;;  %v843_v10 = vld [vmem:[#allocation8] sm:$0xff]   ;;  %v844_v11 = vld [vmem:[#allocation8 + $0x8] sm:$0xff]   ;;  %s553_s15 = sshll.u32 %s280_s11, 4  ;;  %s540_s25 = scalar_lea.sflag [#allocation5], %s1250_s13  ;;  %s1278_s15 = int_to_ptr.vmem [resolvable:$true] %s553_s15 }
  0x70   : > { %710 = vmatprep.subr.bf16.mxu0 %v1032_v0  ;;  %729 = vmatpush3.bf16.msra.mxu1 %v843_v10  ;;  %v845_v12 = vld [vmem:[#allocation8 + $0x10] sm:$0xff]   ;;  %v846_v13 = vld [vmem:[#allocation8 + $0x18] sm:$0xff]   ;;  %v847_v14 = vld [vmem:[#allocation8 + $0x20] sm:$0xff]   ;;  %s939_s21 = scalar_lea.vmem %s1278_s15, 128  ;;  %p1345_p12 = scmp.ne.s32.totalorder %s1341_s8, 0 }
  0x71   : > { %730 = vmatprep.subr.bf16.mxu1 %v1032_v0  ;;  %v848_v15 = vld [vmem:[#allocation8 + $0x28] sm:$0xff]   ;;  %v849_v16 = vld [vmem:[#allocation8 + $0x30] sm:$0xff]   ;;  %v850_v17 = vld [vmem:[#allocation8 + $0x38] sm:$0xff]   ;;  %p940_p8 = scmp.ne.s32.totalorder %s1278_s15, %s939_s21  ;;  %s1034_s16 = smov [#allocation9]  }
  0x72   : > { %v668_v18 = vld [vmem:[%s1327_s2] ss:$0 sm:$0xff]  ;;  %s943_s17 = sshll.u32 %s1034_s16, 4  ;;  %s944_s17 = int_to_ptr.vmem [resolvable:$false] %s943_s17 }
  0x73   : > { %711 = vmatpush3.bf16.msra.mxu0 %v836_v2  ;;  %v685_v34 = vld [vmem:[%s1329_s4] ss:$0 sm:$0xff]  ;;  %p941_p1 = pnand %p940_p8, %p1345_p12  ;;  %s945_s26 = scalar_lea.vmem %s944_s17, 256 }
  0x74   : > { %712 = vmatprep.subr.bf16.mxu0 %v1032_v0  ;;  %731 = vmatpush3.bf16.msra.mxu1 %v844_v11  ;;  %p946_p3 = scmp.lt.s32.totalorder %s1278_s15, %s944_s17  ;;  %p947_p5 = scmp.lt.s32.totalorder %s945_s26, %s939_s21 }
  0x75   : > { %732 = vmatprep.subr.bf16.mxu1 %v1032_v0  ;;  %p942_p10 = pneg %p941_p1 }
  0x76   : > { %p948_p9 = por %p947_p5, %p946_p3 }
  0x77   : > { %713 = vmatpush3.bf16.msra.mxu0 %v837_v3 }
  0x78   : > { %714 = vmatprep.subr.bf16.mxu0 %v1032_v0  ;;  %733 = vmatpush3.bf16.msra.mxu1 %v845_v12  ;;  %p949_p11 = pnand %p948_p9, %p942_p10 }
  0x79   : > { %734 = vmatprep.subr.bf16.mxu1 %v1032_v0 }
  0x7b   : > { %715 = vmatpush3.bf16.msra.mxu0 %v838_v4 }
  0x7c   : > { %716 = vmatprep.subr.bf16.mxu0 %v1032_v0  ;;  %735 = vmatpush3.bf16.msra.mxu1 %v846_v13 }
  0x7d   : > { %736 = vmatprep.subr.bf16.mxu1 %v1032_v0 }
  0x7f   : > { %717 = vmatpush3.bf16.msra.mxu0 %v839_v5 }
  0x80   : > { %718 = vmatprep.subr.bf16.mxu0 %v1032_v0  ;;  %737 = vmatpush3.bf16.msra.mxu1 %v847_v14 }
  0x81   : > { %738 = vmatprep.subr.bf16.mxu1 %v1032_v0 }
  0x83   : > { %719 = vmatpush3.bf16.msra.mxu0 %v840_v6 }
  0x84   : > { %720 = vmatprep.subr.bf16.mxu0 %v1032_v0  ;;  %739 = vmatpush3.bf16.msra.mxu1 %v848_v15 }
  0x85   : > { %740 = vmatprep.subr.bf16.mxu1 %v1032_v0 }
  0x87   : > { %721 = vmatpush3.bf16.msra.mxu0 %v841_v7 }
  0x88   : > { %722 = vmatprep.subr.bf16.mxu0 %v1032_v0  ;;  %741 = vmatpush3.bf16.msra.mxu1 %v849_v16 }
  0x89   : > { %742 = vmatprep.subr.bf16.mxu1 %v1032_v0 }
  0x8b   : > { %723 = vmatpush3.bf16.msra.mxu0 %v842_v8 }
  0x8c   : > { %743 = vmatpush3.bf16.msra.mxu1 %v850_v17 }
  0x8e   : > { %725 = vmatmul.mubr.bf16.vlgmr.msra.gmra.mrb[0].mxu0 %v330_v9 }
 0x161   : > { %v419_v19 = vpop.f32.mrb[0].mxu0 }
 0x162   : > { %v420_v20 = vadd.f32 %v668_v18, %v419_v19  ;;  %v726_v21 = vpop.f32.mrb[1].mxu0 }
 0x163   : > { %v422_v22 = vpop.f32.mrb[2].mxu0 }
 0x164   : > { %v425_v23 = vmul.f32 %v420_v20, %v420_v20  ;;  %v727_v24 = vpop.f32.mrb[3].mxu0 }
 0x166   : > { %v426_v25 = vmul.f32 %v425_v23, %v420_v20 }
 0x168   : > { %v427_v26 = vmul.f32 0.044715, %v426_v25 }
 0x16a   : > { %v428_v27 = vadd.f32 %v427_v26, %v420_v20 }
 0x16c   : > { %v429_v28 = vmul.f32 0.7978846, %v428_v27 }
 0x16e   : > { %851 = vtanh.f32 %v429_v28 }
 0x178   : > { %v852_v29 = vpop.eup %851 }
 0x179   : > { %v431_v30 = vadd.f32 1.0, %v852_v29 }
 0x17b   : > { %v432_v31 = vmul.f32 0.5, %v431_v30 }
 0x17d   : > { %v433_v32 = vmul.f32 %v432_v31, %v420_v20 }
 0x17f   : > { %v435_v33 = vpack.c.bf16 %v433_v32, %v433_v32 }
 0x181   : > { %745 = vmatmul.mubr.bf16.vlgmr.msra.gmra.mrb[0].mxu1 %v435_v33 }
 0x254   : > { %v518_v35 = vpop.f32.mrb[0].mxu1 }
 0x255   : > { %v537_v36 = vadd.f32 %v685_v34, %v518_v35  ;;  %v746_v37 = vpop.f32.mrb[1].mxu1 }
 0x256   : > { %v521_v38 = vpop.f32.mrb[2].mxu1 }
 0x257   : > { %538 = vst [vmem:[%s280_s11] sm:$0xff] %v537_v36  ;;  %v747_v39 = vpop.f32.mrb[3].mxu1 }
 0x258   : > { %952 = shalt.err (!%p949_p11)
}
 0x259   : > { %s953_s13 = scalar_lea.hbm %s1276_s10, 128  ;;  %s957_s24 = scalar_lea.hbm %s1330_s5, 256 }
 0x25a   : > { %p954_p0 = scmp.ne.s32.totalorder %s1276_s10, %s953_s13  ;;  %p958_p6 = scmp.lt.u32.totalorder %s1276_s10, %s1330_s5 }
 0x25b   : > { %p959_p7 = scmp.lt.u32.totalorder %s957_s24, %s953_s13  ;;  %p961_p8 = scmp.lt.u32.totalorder %s953_s13, %s1276_s10 }
 0x25c   : > { %p955_p4 = pnand %p954_p0, %p1345_p12 }
 0x25d   : > { %p960_p2 = por %p959_p7, %p958_p6 }
 0x25e   : > { %p956_p13 = pneg %p955_p4 }
 0x25f   : > { %p962_p1 = por %p961_p8, %p960_p2 }
 0x261   : > { %p963_p10 = pnand %p962_p1, %p956_p13 }
 0x263   : > { %966 = shalt.err (!%p963_p10)
}
 0x264   : > { %758 = dma.vmem_to_hbm [thread:$0]  (%p1345_p12), %s1278_s15, 128, %s1276_s10, %s540_s25  }
 0x265 PF: > { %s565_s11 = sand.u32 1, %s1005_s18   ;;  %p1346_p3 = scmp.ne.s32.totalorder %s1338_s29, 0 }
 0x266   : > { %p1347_p5 = scmp.ge.s32.totalorder %s1025_s23, 2  ;;  %s566_s27 = scalar_lea.sflag [#allocation5], %s565_s11 }
 0x268   : > { %p772_p9 = pnand %p1347_p5, %p1346_p3 }
 0x26a   : > { %1000 = dma.done.wait (!%p772_p9), %s566_s27, 128  }
 0x26b   : > { %1002 = vsyncadd (!%p772_p9), %s566_s27, 4294967168  ;;  %s22_s23 = sadd.s32 1, %s1025_s23   ;;  %s1348_s18 = smov %s1009_s19 }
 0x26c   : > { %p19_p11 = scmp.ge.s32.totalorder %s22_s23, 4   ;;  %s1349_s19 = smov %s1013_s20 }
 0x26d   : > { %s1350_s20 = smov %s1207_s6  ;;  %s1351_s21 = smov %s1021_s22 }
 0x26e   : > { %s1352_s22 = smov %s1354_s12  ;;  %21 = sbr.rel (!%p19_p11) target bundleno = 7 (0x7), region = 104 }
 0x275   :  { %571 = vsyncpa [#allocation4], 1 }
 0x276   :  { %573 = vsyncpa [#allocation4 + $0x1], 1 }
 0x277   :  { %574 = vsyncpa [#allocation7], 1 }
 0x278   :  { %575 = vsyncpa [#allocation5], 1 }
 0x279   :  { %577 = vsyncpa [#allocation5 + $0x1], 1 }

</bundles_post_ra>
